<compile_context>
chip_gen: v6e
topology: v6e:2x2x1
jax: 0.10.0
libtpu: 0.0.40
codegen_flags: <defaults>
</compile_context>

<pallas_src>
import functools

import jax
import jax.numpy as jnp
import numpy as np
from jax import lax
from jax.experimental import pallas as pl
from jax.experimental.pallas import tpu as pltpu


# ----------------------------------------------------------------------------
# Fused forward kernel: one grid step == Bb batch graphs, everything in VMEM.
# ----------------------------------------------------------------------------
def _fused_forward_kernel(x_ref, w1t_ref, b1_ref, wl_ref, blcat_ref, wrcat_ref,
                          wf_ref, bf_ref, w2t_ref, b2_ref, o_ref,
                          *, type_slices, Bb, NT, lp, H, compute_dtype):
    cd = compute_dtype
    f32 = jnp.float32
    T = len(type_slices)

    # -- linear1 restricted to the node channels, lane-dense over Bb batches:
    #    f_lane[k, j*lp + m] = linear1(x_bj)[node perm[k], flat(l,p)=m]
    x = x_ref[...].astype(cd)                                              # [D, Bb*lp]
    f_lane = jnp.dot(w1t_ref[...], x,
                     preferred_element_type=f32) + b1_ref[...]             # [NT, Bb*lp]

    # -- relayout: lane-stacked batches -> row-stacked (batch-major node rows).
    #    Tiny tile; static lane slices + sublane concat only (robust Mosaic ops).
    f_sub = jnp.concatenate([f_lane[:, j * lp:(j + 1) * lp] for j in range(Bb)],
                            axis=0)                                        # [Bb*NT, lp]
    fc = f_sub.astype(cd)

    # -- per-(batch, src-type) neighbor sums via in-kernel 0/1 selector matmuls.
    #    (1/n_src and the HeteroConv 1/num_edge_types are folded into wl outside.)
    colc = lax.broadcasted_iota(jnp.int32, (Bb, Bb * NT), 1)
    rowb = lax.broadcasted_iota(jnp.int32, (Bb, Bb * NT), 0)
    base = rowb * NT
    in_batch = (colc >= base) & (colc < base + NT)
    k_rel = colc - base
    msg = None                                                             # [Bb, T*H]
    for s, (off, n) in enumerate(type_slices):
        sel = jnp.where(in_batch & (k_rel >= off) & (k_rel < off + n),
                        1.0, 0.0).astype(cd)                               # [Bb, Bb*NT]
        sum_s = jnp.dot(sel, fc, preferred_element_type=f32)               # [Bb, D] (f32 acc)
        term = jnp.dot(sum_s.astype(cd), wl_ref[s],
                       preferred_element_type=f32)                         # [Bb, T*H]
        msg = term if msg is None else msg + term

    # -- broadcast msg over each batch's NT node rows with a tiny exact 0/1 matmul.
    r_iota = lax.broadcasted_iota(jnp.int32, (Bb * NT, Bb), 0)
    j_iota = lax.broadcasted_iota(jnp.int32, (Bb * NT, Bb), 1)
    jb = j_iota * NT
    R = jnp.where((r_iota >= jb) & (r_iota < jb + NT), 1.0, 0.0)           # f32, exact
    msg_rows = jnp.dot(R, msg, preferred_element_type=f32)                 # [Bb*NT, T*H]

    # -- SAGE 'root' terms for every dst type at once (wide, lane-stacked dst blocks).
    roots = jnp.dot(fc, wrcat_ref[...], preferred_element_type=f32)        # [Bb*NT, T*H]
    agg_wide = roots + msg_rows + blcat_ref[...]

    # -- keep only each node's own dst-type lane block (mask built from iota,
    #    no div/mod), then relu and collapse T*H -> d_model via pre-tiled Wf.
    rows1 = lax.broadcasted_iota(jnp.int32, (Bb * NT, 1), 0)
    lanes1 = lax.broadcasted_iota(jnp.int32, (1, T * H), 1)
    qmask = None
    for t, (off, n) in enumerate(type_slices):
        row_in = (rows1 >= off) & (rows1 < off + n)
        for j in range(1, Bb):
            row_in = row_in | ((rows1 >= j * NT + off) & (rows1 < j * NT + off + n))
        lane_in = (lanes1 >= t * H) & (lanes1 < (t + 1) * H)
        m = jnp.where(row_in & lane_in, 1.0, 0.0)
        qmask = m if qmask is None else qmask + m

    a = (jnp.maximum(agg_wide, 0.0) * qmask).astype(cd)                    # [Bb*NT, T*H]
    g_sub = jnp.dot(a, wf_ref[...],
                    preferred_element_type=f32) + bf_ref[...]              # [Bb*NT, lp]

    # -- relayout back: row-stacked -> lane-stacked for the channel-scatter linear2.
    g_lane = jnp.concatenate([g_sub[j * NT:(j + 1) * NT, :] for j in range(Bb)],
                             axis=1)                                       # [NT, Bb*lp]

    # -- linear2 with the node->channel scatter folded into pre-gathered W2 rows;
    #    lane-dense output store [out_ch, Bb*lp].
    z = jnp.dot(w2t_ref[...], g_lane.astype(cd),
                preferred_element_type=f32) + b2_ref[...]                  # [out_ch, Bb*lp]
    o_ref[...] = z.astype(o_ref.dtype)


# ----------------------------------------------------------------------------
# Trace-time weight folding (tiny, weight-only work; fused by XLA under jit)
# ----------------------------------------------------------------------------
def precompute_operands(params, node_types, edge_types_all, compute_dtype=jnp.float32):
    types = list(node_types.keys())
    num_t = len(types)
    d_model = params["W1"].shape[0]
    hidden = params["Wf"].shape[0]

    # node permutation that groups nodes of the same type contiguously
    perm, offsets = [], {}
    for t in types:
        offsets[t] = len(perm)
        perm.extend(node_types[t])
    assert len(set(perm)) == len(perm), "node type index sets must be disjoint"
    perm_np = np.asarray(perm, dtype=np.int32)
    nt_total = len(perm)

    counts = {t: 0 for t in types}
    for (_, _, dst) in edge_types_all:
        counts[dst] += 1

    zero_dh = jnp.zeros((d_model, hidden), jnp.float32)
    wl_fold = {(s, t): zero_dh for s in types for t in types}
    wr_comb = {t: zero_dh for t in types}
    bl_comb = {t: jnp.zeros((hidden,), jnp.float32) for t in types}
    for et in edge_types_all:
        src, _, dst = et
        name = "__".join(et)
        inv_e = 1.0 / counts[dst]               # HeteroConv 'mean' over edge types
        inv_n = 1.0 / len(node_types[src])      # neighbor mean (fully-connected bipartite)
        wl_fold[(src, dst)] = wl_fold[(src, dst)] + (inv_e * inv_n) * params["Wl"][name]
        wr_comb[dst] = wr_comb[dst] + inv_e * params["Wr"][name]
        bl_comb[dst] = bl_comb[dst] + inv_e * params["bl"][name]

    # [T_src, D, T_dst*H]: per-source-type folded message weights, dst types lane-stacked
    wl = jnp.stack([jnp.concatenate([wl_fold[(s, t)] for t in types], axis=1)
                    for s in types], axis=0)
    wrcat = jnp.concatenate([wr_comb[t] for t in types], axis=1)            # [D, T*H]
    blcat = jnp.concatenate([bl_comb[t] for t in types]).reshape(1, num_t * hidden)
    wf_tiled = jnp.tile(params["Wf"], (num_t, 1))                           # [T*H, D]
    bf = params["bf"].reshape(1, -1)

    w1t = params["W1"][:, perm_np].T                                        # [NT, D]
    b1 = params["b1"][perm_np].reshape(nt_total, 1)

    # node types with no incoming edge type contribute zeros (see module-level TODO)
    valid = np.concatenate([np.full(len(node_types[t]),
                                    1.0 if counts[t] > 0 else 0.0, np.float32)
                            for t in types])
    w2t = (params["W2"][perm_np, :] * jnp.asarray(valid)[:, None]).T        # [out_ch, NT]
    b2 = params["b2"].reshape(-1, 1)

    cd = compute_dtype
    arrays = dict(w1t=w1t.astype(cd), b1=b1, wl=wl.astype(cd), blcat=blcat,
                  wrcat=wrcat.astype(cd), wf=wf_tiled.astype(cd), bf=bf,
                  w2t=w2t.astype(cd), b2=b2)
    static = dict(type_slices=tuple((offsets[t], len(node_types[t])) for t in types),
                  nt_total=nt_total, hidden=hidden)
    return arrays, static


def _zero_map(ndim):
    return lambda b: (0,) * ndim


# ----------------------------------------------------------------------------
# Forward
# ----------------------------------------------------------------------------
def learnable_adj_hetero_conv_forward(x, params, node_types, edge_types_all,
                                      compute_dtype=jnp.float32, batch_block=None):
    B, d_model, L, P = x.shape
    lp = L * P
    assert d_model == lp, "forward requires input_dim == L_div_P * P"
    out_ch = params["W2"].shape[1]

    ops, static = precompute_operands(params, node_types, edge_types_all, compute_dtype)
    NT = static["nt_total"]
    H = static["hidden"]
    T = len(static["type_slices"])

    # Batch blocking: target ~256 output lanes per grid step (v6e/v7x MXU width);
    # on a v7x keeping ceil(B/Bb) >= 2 lets the two TensorCores split the grid.
    if batch_block is None:
        batch_block = max(1, 256 // lp)
    Bb = int(min(B, batch_block))
    nblk = -(-B // Bb)
    Bpad = nblk * Bb

    x3 = x.reshape(B, d_model, lp)
    if Bpad != B:
        x3 = jnp.concatenate([x3, jnp.zeros((Bpad - B, d_model, lp), x.dtype)], axis=0)
    # lane-stack Bb graphs per block (layout plumbing in the wrapper, not the kernel)
    x_blocks = (x3.reshape(nblk, Bb, d_model, lp)
                .transpose(0, 2, 1, 3)
                .reshape(nblk, d_model, Bb * lp))

    kernel = functools.partial(_fused_forward_kernel,
                               type_slices=static["type_slices"],
                               Bb=Bb, NT=NT, lp=lp, H=H,
                               compute_dtype=compute_dtype)

    names = ("w1t", "b1", "wl", "blcat", "wrcat", "wf", "bf", "w2t", "b2")
    weight_specs = [pl.BlockSpec(ops[k].shape, _zero_map(ops[k].ndim)) for k in names]

    # advisory cost estimate for XLA's scheduler
    bbl = Bb * lp
    th = T * H
    flops_step = 2 * (NT * d_model * bbl
                      + T * Bb * (Bb * NT) * d_model
                      + T * Bb * d_model * th
                      + (Bb * NT) * Bb * th
                      + (Bb * NT) * d_model * th
                      + (Bb * NT) * th * d_model
                      + out_ch * NT * bbl)
    wbytes = sum(int(np.prod(ops[k].shape)) * jnp.dtype(ops[k].dtype).itemsize
                 for k in names)
    cost = pl.CostEstimate(flops=int(flops_step) * nblk,
                           transcendentals=0,
                           bytes_accessed=int(nblk * d_model * bbl * 4 + wbytes
                                              + nblk * out_ch * bbl * 4))

    z = pl.pallas_call(
        kernel,
        out_shape=jax.ShapeDtypeStruct((nblk, out_ch, Bb * lp), jnp.float32),
        grid=(nblk,),
        in_specs=[pl.BlockSpec((None, d_model, Bb * lp), lambda b: (b, 0, 0))]
                 + weight_specs,
        out_specs=pl.BlockSpec((None, out_ch, Bb * lp), lambda b: (b, 0, 0)),
        compiler_params=pltpu.CompilerParams(dimension_semantics=("parallel",)),
        cost_estimate=cost,
    )(x_blocks, *[ops[k] for k in names])

    # un-stack lanes back to (B, out_ch, L, P)
    y = (z.reshape(nblk, out_ch, Bb, lp)
         .transpose(0, 2, 1, 3)
         .reshape(Bpad, out_ch, lp))[:B]
    return y.reshape(B, out_ch, L, P)


# ----------------------------------------------------------------------------
# Parameter initialization (deterministic, PyTorch-Linear-style shapes)
# ----------------------------------------------------------------------------
def init_params(key, edge_types_all, d_model, N, hidden, out_channels):
    def dense(k, fan_in, fan_out, bias=True):
        kw, kb = jax.random.split(k)
        lim = 1.0 / (fan_in ** 0.5)
        W = jax.random.uniform(kw, (fan_in, fan_out), jnp.float32, -lim, lim)
        b = jax.random.uniform(kb, (fan_out,), jnp.float32, -lim, lim) if bias else None
        return W, b

    keys = list(jax.random.split(key, 3 + 2 * len(edge_types_all)))
    params = {}
    params["W1"], params["b1"] = dense(keys.pop(), d_model, N)             # linear1
    params["W2"], params["b2"] = dense(keys.pop(), d_model, out_channels)  # linear2
    params["Wf"], params["bf"] = dense(keys.pop(), hidden, d_model)        # final_linear
    params["Wl"], params["bl"], params["Wr"] = {}, {}, {}
    for et in edge_types_all:
        s = "__".join(et)
        wl, bl = dense(keys.pop(), d_model, hidden)              # SAGEConv lin_l (bias)
        wr, _ = dense(keys.pop(), d_model, hidden, bias=False)   # SAGEConv lin_r (no bias)
        params["Wl"][s], params["bl"][s], params["Wr"][s] = wl, bl, wr
    # TODO(synk): U/V low-rank adjacency params are never used in forward(); not materialized.
    return params


# ----------------------------------------------------------------------------
# Pure-jnp reference of the original (unfolded) semantics, for self-check
# ----------------------------------------------------------------------------
def reference_forward(x, params, node_types, edge_types_all):
    B, d_model, L, P = x.shape
    lp = L * P
    x2 = jnp.transpose(x, (0, 2, 3, 1)).reshape(B * lp, d_model)
    h = x2 @ params["W1"] + params["b1"]
    n_lin = h.shape[1]
    h = h.reshape(B, L, P, n_lin).transpose(0, 3, 1, 2)          # [B, N, L, P]
    f = h.reshape(B, n_lin, lp)

    sums = {t: None for t in node_types}
    counts = {t: 0 for t in node_types}
    for et in edge_types_all:
        src_t, _, dst_t = et
        name = "__".join(et)
        src_idx = jnp.asarray(node_types[src_t])
        dst_idx = jnp.asarray(node_types[dst_t])
        mean_src = f[:, src_idx, :].mean(axis=1)                 # [B, D]
        msg = mean_src @ params["Wl"][name] + params["bl"][name]
        root = jnp.einsum('bnd,dh->bnh', f[:, dst_idx, :], params["Wr"][name])
        o = root + msg[:, None, :]
        sums[dst_t] = o if sums[dst_t] is None else sums[dst_t] + o
        counts[dst_t] += 1

    out_nodes = jnp.zeros((B, d_model, lp), jnp.float32)
    for t, idx in node_types.items():
        if counts[t] == 0:
            continue
        agg = sums[t] / counts[t]
        g = jnp.maximum(agg, 0.0) @ params["Wf"] + params["bf"]  # [B, n_t, d_model]
        out_nodes = out_nodes.at[:, jnp.asarray(idx), :].set(g)

    y2 = out_nodes.transpose(0, 2, 1).reshape(B * lp, d_model)
    z = y2 @ params["W2"] + params["b2"]
    out_ch = params["W2"].shape[1]
    return z.reshape(B, lp, out_ch).transpose(0, 2, 1).reshape(B, out_ch, L, P)


# ----------------------------------------------------------------------------
# Example run
# ----------------------------------------------------------------------------
if __name__ == "__main__":
    B, L_div_P, P = 2, 4, 8
    d_model = L_div_P * P          # input_dim must equal L_div_P * P (see forward)
    N = 10
    hidden_channels = 16
    out_channels = 8

    node_types = {"A": [0, 1, 3], "B": [2, 4, 5, 6], "C": [7, 8, 9]}
    edge_types = [("A", "to", "B"), ("B", "to", "C"), ("C", "to", "A")]
    # add_self_loops=True in the module:
    edge_types_all = list(edge_types) + [(t, "self", t) for t in node_types]

    key = jax.random.PRNGKey(0)
    kx, kp = jax.random.split(key)
    x = jax.random.normal(kx, (B, d_model, L_div_P, P), jnp.float32)
    params = init_params(kp, edge_types_all, d_model, N, hidden_channels, out_channels)

    fwd = jax.jit(functools.partial(learnable_adj_hetero_conv_forward,
                                    node_types=node_types,
                                    edge_types_all=edge_types_all))
    out = jax.block_until_ready(fwd(x, params))
    assert out.shape == (B, out_channels, L_div_P, P)
    assert out.dtype == jnp.float32

    # correctness self-check against the unfolded reference (f32 path; tolerance
    # covers default-precision MXU matmuls and the weight-folding reassociation)
    ref = jax.block_until_ready(reference_forward(x, params, node_types, edge_types_all))
    np.testing.assert_allclose(np.asarray(out), np.asarray(ref), rtol=2e-2, atol=2e-2)

    print("KERNEL_OK")
</pallas_src>

<mosaic_0001>
module attributes {stable_mosaic.version = 11 : i64} {
  func.func @_fused_forward_kernel(%arg0: i32, %arg1: memref<1x32x64xf32, #tpu.memory_space<vmem>>, %arg2: memref<10x32xf32, #tpu.memory_space<vmem>>, %arg3: memref<10x1xf32, #tpu.memory_space<vmem>>, %arg4: memref<3x32x48xf32, #tpu.memory_space<vmem>>, %arg5: memref<1x48xf32, #tpu.memory_space<vmem>>, %arg6: memref<32x48xf32, #tpu.memory_space<vmem>>, %arg7: memref<48x32xf32, #tpu.memory_space<vmem>>, %arg8: memref<1x32xf32, #tpu.memory_space<vmem>>, %arg9: memref<8x10xf32, #tpu.memory_space<vmem>>, %arg10: memref<8x1xf32, #tpu.memory_space<vmem>>, %arg11: memref<1x8x64xf32, #tpu.memory_space<vmem>>) attributes {dimension_semantics = [#tpu.dimension_semantics<parallel>], iteration_bounds = array<i64: 1>, scalar_prefetch = 0 : i64, scratch_operands = 0 : i64, tpu.core_type = #tpu.core_type<tc>, window_params = [{transform_indices = @transform_0, window_bounds = array<i64: 1, 32, 64>}, {pipeline_mode = #tpu.pipeline_mode<synchronous>, transform_indices = @transform_1, window_bounds = array<i64: 10, 32>}, {pipeline_mode = #tpu.pipeline_mode<synchronous>, transform_indices = @transform_2, window_bounds = array<i64: 10, 1>}, {pipeline_mode = #tpu.pipeline_mode<synchronous>, transform_indices = @transform_3, window_bounds = array<i64: 3, 32, 48>}, {pipeline_mode = #tpu.pipeline_mode<synchronous>, transform_indices = @transform_4, window_bounds = array<i64: 1, 48>}, {pipeline_mode = #tpu.pipeline_mode<synchronous>, transform_indices = @transform_5, window_bounds = array<i64: 32, 48>}, {pipeline_mode = #tpu.pipeline_mode<synchronous>, transform_indices = @transform_6, window_bounds = array<i64: 48, 32>}, {pipeline_mode = #tpu.pipeline_mode<synchronous>, transform_indices = @transform_7, window_bounds = array<i64: 1, 32>}, {pipeline_mode = #tpu.pipeline_mode<synchronous>, transform_indices = @transform_8, window_bounds = array<i64: 8, 10>}, {pipeline_mode = #tpu.pipeline_mode<synchronous>, transform_indices = @transform_9, window_bounds = array<i64: 8, 1>}, {transform_indices = @transform_10, window_bounds = array<i64: 1, 8, 64>}]} {
    %c0 = arith.constant 0 : index
    %c0_0 = arith.constant 0 : index
    %c0_1 = arith.constant 0 : index
    %0 = vector.load %arg1[%c0, %c0_0, %c0_1] : memref<1x32x64xf32, #tpu.memory_space<vmem>>, vector<1x32x64xf32>
    %1 = vector.shape_cast %0 : vector<1x32x64xf32> to vector<32x64xf32>
    %c0_2 = arith.constant 0 : index
    %c0_3 = arith.constant 0 : index
    %2 = vector.load %arg2[%c0_2, %c0_3] : memref<10x32xf32, #tpu.memory_space<vmem>>, vector<10x32xf32>
    %cst = arith.constant dense<0.000000e+00> : vector<10x64xf32>
    %3 = tpu.matmul %2, %1, %cst {dimension_numbers = #tpu.dot_dimension_numbers<[1], [0], [0], [1], [0, 0, 1, 1], [], []>} : vector<10x32xf32>, vector<32x64xf32>, vector<10x64xf32> -> vector<10x64xf32>
    %c0_4 = arith.constant 0 : index
    %c0_5 = arith.constant 0 : index
    %4 = vector.load %arg3[%c0_4, %c0_5] : memref<10x1xf32, #tpu.memory_space<vmem>>, vector<10x1xf32>
    %5 = vector.broadcast %4 : vector<10x1xf32> to vector<10x64xf32>
    %6 = arith.addf %3, %5 : vector<10x64xf32>
    %7 = vector.extract_strided_slice %6 {offsets = [0, 0], sizes = [10, 32], strides = [1, 1]} : vector<10x64xf32> to vector<10x32xf32>
    %8 = vector.extract_strided_slice %6 {offsets = [0, 32], sizes = [10, 32], strides = [1, 1]} : vector<10x64xf32> to vector<10x32xf32>
    %9 = tpu.concatenate %7, %8 in 0 : vector<10x32xf32>, vector<10x32xf32> -> vector<20x32xf32>
    %10 = tpu.iota {dimensions = array<i32: 1>} : vector<2x20xi32>
    %11 = tpu.iota {dimensions = array<i32: 0>} : vector<2x20xi32>
    %c10_i32 = arith.constant 10 : i32
    %12 = vector.broadcast %c10_i32 : i32 to vector<2x20xi32>
    %13 = arith.muli %11, %12 : vector<2x20xi32>
    %14 = arith.cmpi sge, %10, %13 : vector<2x20xi32>
    %c10_i32_6 = arith.constant 10 : i32
    %15 = vector.broadcast %c10_i32_6 : i32 to vector<2x20xi32>
    %16 = arith.addi %13, %15 : vector<2x20xi32>
    %17 = arith.cmpi slt, %10, %16 : vector<2x20xi32>
    %18 = arith.andi %14, %17 : vector<2x20xi1>
    %19 = arith.subi %10, %13 : vector<2x20xi32>
    %c0_i32 = arith.constant 0 : i32
    %20 = vector.broadcast %c0_i32 : i32 to vector<2x20xi32>
    %21 = arith.cmpi sge, %19, %20 : vector<2x20xi32>
    %22 = arith.andi %18, %21 : vector<2x20xi1>
    %c3_i32 = arith.constant 3 : i32
    %23 = vector.broadcast %c3_i32 : i32 to vector<2x20xi32>
    %24 = arith.cmpi slt, %19, %23 : vector<2x20xi32>
    %25 = arith.andi %22, %24 : vector<2x20xi1>
    %cst_7 = arith.constant 1.000000e+00 : f32
    %cst_8 = arith.constant 0.000000e+00 : f32
    %26 = vector.broadcast %cst_7 : f32 to vector<2x20xf32>
    %27 = vector.broadcast %cst_8 : f32 to vector<2x20xf32>
    %28 = arith.select %25, %26, %27 : vector<2x20xi1>, vector<2x20xf32>
    %cst_9 = arith.constant dense<0.000000e+00> : vector<2x32xf32>
    %29 = tpu.matmul %28, %9, %cst_9 {dimension_numbers = #tpu.dot_dimension_numbers<[1], [0], [0], [1], [0, 0, 1, 1], [], []>} : vector<2x20xf32>, vector<20x32xf32>, vector<2x32xf32> -> vector<2x32xf32>
    %c0_10 = arith.constant 0 : index
    %c0_11 = arith.constant 0 : index
    %c0_12 = arith.constant 0 : index
    %30 = vector.load %arg4[%c0_10, %c0_11, %c0_12] : memref<3x32x48xf32, #tpu.memory_space<vmem>>, vector<1x32x48xf32>
    %31 = vector.shape_cast %30 : vector<1x32x48xf32> to vector<32x48xf32>
    %cst_13 = arith.constant dense<0.000000e+00> : vector<2x48xf32>
    %32 = tpu.matmul %29, %31, %cst_13 {dimension_numbers = #tpu.dot_dimension_numbers<[1], [0], [0], [1], [0, 0, 1, 1], [], []>} : vector<2x32xf32>, vector<32x48xf32>, vector<2x48xf32> -> vector<2x48xf32>
    %c3_i32_14 = arith.constant 3 : i32
    %33 = vector.broadcast %c3_i32_14 : i32 to vector<2x20xi32>
    %34 = arith.cmpi sge, %19, %33 : vector<2x20xi32>
    %35 = arith.andi %18, %34 : vector<2x20xi1>
    %c7_i32 = arith.constant 7 : i32
    %36 = vector.broadcast %c7_i32 : i32 to vector<2x20xi32>
    %37 = arith.cmpi slt, %19, %36 : vector<2x20xi32>
    %38 = arith.andi %35, %37 : vector<2x20xi1>
    %cst_15 = arith.constant 1.000000e+00 : f32
    %cst_16 = arith.constant 0.000000e+00 : f32
    %39 = vector.broadcast %cst_15 : f32 to vector<2x20xf32>
    %40 = vector.broadcast %cst_16 : f32 to vector<2x20xf32>
    %41 = arith.select %38, %39, %40 : vector<2x20xi1>, vector<2x20xf32>
    %cst_17 = arith.constant dense<0.000000e+00> : vector<2x32xf32>
    %42 = tpu.matmul %41, %9, %cst_17 {dimension_numbers = #tpu.dot_dimension_numbers<[1], [0], [0], [1], [0, 0, 1, 1], [], []>} : vector<2x20xf32>, vector<20x32xf32>, vector<2x32xf32> -> vector<2x32xf32>
    %c1 = arith.constant 1 : index
    %c0_18 = arith.constant 0 : index
    %c0_19 = arith.constant 0 : index
    %43 = vector.load %arg4[%c1, %c0_18, %c0_19] : memref<3x32x48xf32, #tpu.memory_space<vmem>>, vector<1x32x48xf32>
    %44 = vector.shape_cast %43 : vector<1x32x48xf32> to vector<32x48xf32>
    %cst_20 = arith.constant dense<0.000000e+00> : vector<2x48xf32>
    %45 = tpu.matmul %42, %44, %cst_20 {dimension_numbers = #tpu.dot_dimension_numbers<[1], [0], [0], [1], [0, 0, 1, 1], [], []>} : vector<2x32xf32>, vector<32x48xf32>, vector<2x48xf32> -> vector<2x48xf32>
    %46 = arith.addf %32, %45 : vector<2x48xf32>
    %c7_i32_21 = arith.constant 7 : i32
    %47 = vector.broadcast %c7_i32_21 : i32 to vector<2x20xi32>
    %48 = arith.cmpi sge, %19, %47 : vector<2x20xi32>
    %49 = arith.andi %18, %48 : vector<2x20xi1>
    %c10_i32_22 = arith.constant 10 : i32
    %50 = vector.broadcast %c10_i32_22 : i32 to vector<2x20xi32>
    %51 = arith.cmpi slt, %19, %50 : vector<2x20xi32>
    %52 = arith.andi %49, %51 : vector<2x20xi1>
    %cst_23 = arith.constant 1.000000e+00 : f32
    %cst_24 = arith.constant 0.000000e+00 : f32
    %53 = vector.broadcast %cst_23 : f32 to vector<2x20xf32>
    %54 = vector.broadcast %cst_24 : f32 to vector<2x20xf32>
    %55 = arith.select %52, %53, %54 : vector<2x20xi1>, vector<2x20xf32>
    %cst_25 = arith.constant dense<0.000000e+00> : vector<2x32xf32>
    %56 = tpu.matmul %55, %9, %cst_25 {dimension_numbers = #tpu.dot_dimension_numbers<[1], [0], [0], [1], [0, 0, 1, 1], [], []>} : vector<2x20xf32>, vector<20x32xf32>, vector<2x32xf32> -> vector<2x32xf32>
    %c2 = arith.constant 2 : index
    %c0_26 = arith.constant 0 : index
    %c0_27 = arith.constant 0 : index
    %57 = vector.load %arg4[%c2, %c0_26, %c0_27] : memref<3x32x48xf32, #tpu.memory_space<vmem>>, vector<1x32x48xf32>
    %58 = vector.shape_cast %57 : vector<1x32x48xf32> to vector<32x48xf32>
    %cst_28 = arith.constant dense<0.000000e+00> : vector<2x48xf32>
    %59 = tpu.matmul %56, %58, %cst_28 {dimension_numbers = #tpu.dot_dimension_numbers<[1], [0], [0], [1], [0, 0, 1, 1], [], []>} : vector<2x32xf32>, vector<32x48xf32>, vector<2x48xf32> -> vector<2x48xf32>
    %60 = arith.addf %46, %59 : vector<2x48xf32>
    %61 = tpu.iota {dimensions = array<i32: 0>} : vector<20x2xi32>
    %62 = tpu.iota {dimensions = array<i32: 1>} : vector<20x2xi32>
    %c10_i32_29 = arith.constant 10 : i32
    %63 = vector.broadcast %c10_i32_29 : i32 to vector<20x2xi32>
    %64 = arith.muli %62, %63 : vector<20x2xi32>
    %65 = arith.cmpi sge, %61, %64 : vector<20x2xi32>
    %c10_i32_30 = arith.constant 10 : i32
    %66 = vector.broadcast %c10_i32_30 : i32 to vector<20x2xi32>
    %67 = arith.addi %64, %66 : vector<20x2xi32>
    %68 = arith.cmpi slt, %61, %67 : vector<20x2xi32>
    %69 = arith.andi %65, %68 : vector<20x2xi1>
    %cst_31 = arith.constant 1.000000e+00 : f32
    %cst_32 = arith.constant 0.000000e+00 : f32
    %70 = vector.broadcast %cst_31 : f32 to vector<20x2xf32>
    %71 = vector.broadcast %cst_32 : f32 to vector<20x2xf32>
    %72 = arith.select %69, %70, %71 : vector<20x2xi1>, vector<20x2xf32>
    %cst_33 = arith.constant dense<0.000000e+00> : vector<20x48xf32>
    %73 = tpu.matmul %72, %60, %cst_33 {dimension_numbers = #tpu.dot_dimension_numbers<[1], [0], [0], [1], [0, 0, 1, 1], [], []>} : vector<20x2xf32>, vector<2x48xf32>, vector<20x48xf32> -> vector<20x48xf32>
    %c0_34 = arith.constant 0 : index
    %c0_35 = arith.constant 0 : index
    %74 = vector.load %arg6[%c0_34, %c0_35] : memref<32x48xf32, #tpu.memory_space<vmem>>, vector<32x48xf32>
    %cst_36 = arith.constant dense<0.000000e+00> : vector<20x48xf32>
    %75 = tpu.matmul %9, %74, %cst_36 {dimension_numbers = #tpu.dot_dimension_numbers<[1], [0], [0], [1], [0, 0, 1, 1], [], []>} : vector<20x32xf32>, vector<32x48xf32>, vector<20x48xf32> -> vector<20x48xf32>
    %76 = arith.addf %75, %73 : vector<20x48xf32>
    %c0_37 = arith.constant 0 : index
    %c0_38 = arith.constant 0 : index
    %77 = vector.load %arg5[%c0_37, %c0_38] : memref<1x48xf32, #tpu.memory_space<vmem>>, vector<1x48xf32>
    %78 = vector.broadcast %77 : vector<1x48xf32> to vector<20x48xf32>
    %79 = arith.addf %76, %78 : vector<20x48xf32>
    %80 = tpu.iota {dimensions = array<i32: 0>} : vector<20x1xi32>
    %81 = tpu.iota {dimensions = array<i32: 1>} : vector<1x48xi32>
    %c0_i32_39 = arith.constant 0 : i32
    %82 = vector.broadcast %c0_i32_39 : i32 to vector<20x1xi32>
    %83 = arith.cmpi sge, %80, %82 : vector<20x1xi32>
    %c3_i32_40 = arith.constant 3 : i32
    %84 = vector.broadcast %c3_i32_40 : i32 to vector<20x1xi32>
    %85 = arith.cmpi slt, %80, %84 : vector<20x1xi32>
    %86 = arith.andi %83, %85 : vector<20x1xi1>
    %c10_i32_41 = arith.constant 10 : i32
    %87 = vector.broadcast %c10_i32_41 : i32 to vector<20x1xi32>
    %88 = arith.cmpi sge, %80, %87 : vector<20x1xi32>
    %c13_i32 = arith.constant 13 : i32
    %89 = vector.broadcast %c13_i32 : i32 to vector<20x1xi32>
    %90 = arith.cmpi slt, %80, %89 : vector<20x1xi32>
    %91 = arith.andi %88, %90 : vector<20x1xi1>
    %92 = arith.ori %86, %91 : vector<20x1xi1>
    %c0_i32_42 = arith.constant 0 : i32
    %93 = vector.broadcast %c0_i32_42 : i32 to vector<1x48xi32>
    %94 = arith.cmpi sge, %81, %93 : vector<1x48xi32>
    %c16_i32 = arith.constant 16 : i32
    %95 = vector.broadcast %c16_i32 : i32 to vector<1x48xi32>
    %96 = arith.cmpi slt, %81, %95 : vector<1x48xi32>
    %97 = arith.andi %94, %96 : vector<1x48xi1>
    %98 = vector.broadcast %92 : vector<20x1xi1> to vector<20x48xi1>
    %99 = vector.broadcast %97 : vector<1x48xi1> to vector<20x48xi1>
    %100 = arith.andi %98, %99 : vector<20x48xi1>
    %cst_43 = arith.constant 1.000000e+00 : f32
    %cst_44 = arith.constant 0.000000e+00 : f32
    %101 = vector.broadcast %cst_43 : f32 to vector<20x48xf32>
    %102 = vector.broadcast %cst_44 : f32 to vector<20x48xf32>
    %103 = arith.select %100, %101, %102 : vector<20x48xi1>, vector<20x48xf32>
    %c3_i32_45 = arith.constant 3 : i32
    %104 = vector.broadcast %c3_i32_45 : i32 to vector<20x1xi32>
    %105 = arith.cmpi sge, %80, %104 : vector<20x1xi32>
    %c7_i32_46 = arith.constant 7 : i32
    %106 = vector.broadcast %c7_i32_46 : i32 to vector<20x1xi32>
    %107 = arith.cmpi slt, %80, %106 : vector<20x1xi32>
    %108 = arith.andi %105, %107 : vector<20x1xi1>
    %c13_i32_47 = arith.constant 13 : i32
    %109 = vector.broadcast %c13_i32_47 : i32 to vector<20x1xi32>
    %110 = arith.cmpi sge, %80, %109 : vector<20x1xi32>
    %c17_i32 = arith.constant 17 : i32
    %111 = vector.broadcast %c17_i32 : i32 to vector<20x1xi32>
    %112 = arith.cmpi slt, %80, %111 : vector<20x1xi32>
    %113 = arith.andi %110, %112 : vector<20x1xi1>
    %114 = arith.ori %108, %113 : vector<20x1xi1>
    %c16_i32_48 = arith.constant 16 : i32
    %115 = vector.broadcast %c16_i32_48 : i32 to vector<1x48xi32>
    %116 = arith.cmpi sge, %81, %115 : vector<1x48xi32>
    %c32_i32 = arith.constant 32 : i32
    %117 = vector.broadcast %c32_i32 : i32 to vector<1x48xi32>
    %118 = arith.cmpi slt, %81, %117 : vector<1x48xi32>
    %119 = arith.andi %116, %118 : vector<1x48xi1>
    %120 = vector.broadcast %114 : vector<20x1xi1> to vector<20x48xi1>
    %121 = vector.broadcast %119 : vector<1x48xi1> to vector<20x48xi1>
    %122 = arith.andi %120, %121 : vector<20x48xi1>
    %cst_49 = arith.constant 1.000000e+00 : f32
    %cst_50 = arith.constant 0.000000e+00 : f32
    %123 = vector.broadcast %cst_49 : f32 to vector<20x48xf32>
    %124 = vector.broadcast %cst_50 : f32 to vector<20x48xf32>
    %125 = arith.select %122, %123, %124 : vector<20x48xi1>, vector<20x48xf32>
    %126 = arith.addf %103, %125 : vector<20x48xf32>
    %c7_i32_51 = arith.constant 7 : i32
    %127 = vector.broadcast %c7_i32_51 : i32 to vector<20x1xi32>
    %128 = arith.cmpi sge, %80, %127 : vector<20x1xi32>
    %c10_i32_52 = arith.constant 10 : i32
    %129 = vector.broadcast %c10_i32_52 : i32 to vector<20x1xi32>
    %130 = arith.cmpi slt, %80, %129 : vector<20x1xi32>
    %131 = arith.andi %128, %130 : vector<20x1xi1>
    %c17_i32_53 = arith.constant 17 : i32
    %132 = vector.broadcast %c17_i32_53 : i32 to vector<20x1xi32>
    %133 = arith.cmpi sge, %80, %132 : vector<20x1xi32>
    %c20_i32 = arith.constant 20 : i32
    %134 = vector.broadcast %c20_i32 : i32 to vector<20x1xi32>
    %135 = arith.cmpi slt, %80, %134 : vector<20x1xi32>
    %136 = arith.andi %133, %135 : vector<20x1xi1>
    %137 = arith.ori %131, %136 : vector<20x1xi1>
    %c32_i32_54 = arith.constant 32 : i32
    %138 = vector.broadcast %c32_i32_54 : i32 to vector<1x48xi32>
    %139 = arith.cmpi sge, %81, %138 : vector<1x48xi32>
    %c48_i32 = arith.constant 48 : i32
    %140 = vector.broadcast %c48_i32 : i32 to vector<1x48xi32>
    %141 = arith.cmpi slt, %81, %140 : vector<1x48xi32>
    %142 = arith.andi %139, %141 : vector<1x48xi1>
    %143 = vector.broadcast %137 : vector<20x1xi1> to vector<20x48xi1>
    %144 = vector.broadcast %142 : vector<1x48xi1> to vector<20x48xi1>
    %145 = arith.andi %143, %144 : vector<20x48xi1>
    %cst_55 = arith.constant 1.000000e+00 : f32
    %cst_56 = arith.constant 0.000000e+00 : f32
    %146 = vector.broadcast %cst_55 : f32 to vector<20x48xf32>
    %147 = vector.broadcast %cst_56 : f32 to vector<20x48xf32>
    %148 = arith.select %145, %146, %147 : vector<20x48xi1>, vector<20x48xf32>
    %149 = arith.addf %126, %148 : vector<20x48xf32>
    %cst_57 = arith.constant 0.000000e+00 : f32
    %150 = vector.broadcast %cst_57 : f32 to vector<20x48xf32>
    %151 = arith.maximumf %79, %150 : vector<20x48xf32>
    %152 = arith.mulf %151, %149 : vector<20x48xf32>
    %c0_58 = arith.constant 0 : index
    %c0_59 = arith.constant 0 : index
    %153 = vector.load %arg7[%c0_58, %c0_59] : memref<48x32xf32, #tpu.memory_space<vmem>>, vector<48x32xf32>
    %cst_60 = arith.constant dense<0.000000e+00> : vector<20x32xf32>
    %154 = tpu.matmul %152, %153, %cst_60 {dimension_numbers = #tpu.dot_dimension_numbers<[1], [0], [0], [1], [0, 0, 1, 1], [], []>} : vector<20x48xf32>, vector<48x32xf32>, vector<20x32xf32> -> vector<20x32xf32>
    %c0_61 = arith.constant 0 : index
    %c0_62 = arith.constant 0 : index
    %155 = vector.load %arg8[%c0_61, %c0_62] : memref<1x32xf32, #tpu.memory_space<vmem>>, vector<1x32xf32>
    %156 = vector.broadcast %155 : vector<1x32xf32> to vector<20x32xf32>
    %157 = arith.addf %154, %156 : vector<20x32xf32>
    %158 = vector.extract_strided_slice %157 {offsets = [0, 0], sizes = [10, 32], strides = [1, 1]} : vector<20x32xf32> to vector<10x32xf32>
    %159 = vector.extract_strided_slice %157 {offsets = [10, 0], sizes = [10, 32], strides = [1, 1]} : vector<20x32xf32> to vector<10x32xf32>
    %160 = tpu.concatenate %158, %159 in 1 : vector<10x32xf32>, vector<10x32xf32> -> vector<10x64xf32>
    %c0_63 = arith.constant 0 : index
    %c0_64 = arith.constant 0 : index
    %161 = vector.load %arg9[%c0_63, %c0_64] : memref<8x10xf32, #tpu.memory_space<vmem>>, vector<8x10xf32>
    %cst_65 = arith.constant dense<0.000000e+00> : vector<8x64xf32>
    %162 = tpu.matmul %161, %160, %cst_65 {dimension_numbers = #tpu.dot_dimension_numbers<[1], [0], [0], [1], [0, 0, 1, 1], [], []>} : vector<8x10xf32>, vector<10x64xf32>, vector<8x64xf32> -> vector<8x64xf32>
    %c0_66 = arith.constant 0 : index
    %c0_67 = arith.constant 0 : index
    %163 = vector.load %arg10[%c0_66, %c0_67] : memref<8x1xf32, #tpu.memory_space<vmem>>, vector<8x1xf32>
    %164 = vector.broadcast %163 : vector<8x1xf32> to vector<8x64xf32>
    %165 = arith.addf %162, %164 : vector<8x64xf32>
    %c0_68 = arith.constant 0 : index
    %c0_69 = arith.constant 0 : index
    %c0_70 = arith.constant 0 : index
    %166 = vector.load %arg11[%c0_68, %c0_69, %c0_70] : memref<1x8x64xf32, #tpu.memory_space<vmem>>, vector<1x8x64xf32>
    %167 = vector.shape_cast %166 : vector<1x8x64xf32> to vector<8x64xf32>
    %168 = vector.shape_cast %165 : vector<8x64xf32> to vector<1x8x64xf32>
    tpu.vector_store %arg11[%c0_68, %c0_69, %c0_70], %168 {strides = array<i32>} : memref<1x8x64xf32, #tpu.memory_space<vmem>>, vector<1x8x64xf32>,
    return
  }
  func.func @transform_0(%arg0: i32) -> (i32, i32, i32) {
    %c0_i32 = arith.constant 0 : i32
    %c0_i32_0 = arith.constant 0 : i32
    %c0_i32_1 = arith.constant 0 : i32
    return %arg0, %c0_i32, %c0_i32_0 : i32, i32, i32
  }
  func.func @transform_1(%arg0: i32) -> (i32, i32) {
    %c0_i32 = arith.constant 0 : i32
    %c0_i32_0 = arith.constant 0 : i32
    %c0_i32_1 = arith.constant 0 : i32
    return %c0_i32, %c0_i32_0 : i32, i32
  }
  func.func @transform_2(%arg0: i32) -> (i32, i32) {
    %c0_i32 = arith.constant 0 : i32
    %c0_i32_0 = arith.constant 0 : i32
    %c0_i32_1 = arith.constant 0 : i32
    return %c0_i32, %c0_i32_0 : i32, i32
  }
  func.func @transform_3(%arg0: i32) -> (i32, i32, i32) {
    %c0_i32 = arith.constant 0 : i32
    %c0_i32_0 = arith.constant 0 : i32
    %c0_i32_1 = arith.constant 0 : i32
    %c0_i32_2 = arith.constant 0 : i32
    return %c0_i32, %c0_i32_0, %c0_i32_1 : i32, i32, i32
  }
  func.func @transform_4(%arg0: i32) -> (i32, i32) {
    %c0_i32 = arith.constant 0 : i32
    %c0_i32_0 = arith.constant 0 : i32
    %c0_i32_1 = arith.constant 0 : i32
    return %c0_i32, %c0_i32_0 : i32, i32
  }
  func.func @transform_5(%arg0: i32) -> (i32, i32) {
    %c0_i32 = arith.constant 0 : i32
    %c0_i32_0 = arith.constant 0 : i32
    %c0_i32_1 = arith.constant 0 : i32
    return %c0_i32, %c0_i32_0 : i32, i32
  }
  func.func @transform_6(%arg0: i32) -> (i32, i32) {
    %c0_i32 = arith.constant 0 : i32
    %c0_i32_0 = arith.constant 0 : i32
    %c0_i32_1 = arith.constant 0 : i32
    return %c0_i32, %c0_i32_0 : i32, i32
  }
  func.func @transform_7(%arg0: i32) -> (i32, i32) {
    %c0_i32 = arith.constant 0 : i32
    %c0_i32_0 = arith.constant 0 : i32
    %c0_i32_1 = arith.constant 0 : i32
    return %c0_i32, %c0_i32_0 : i32, i32
  }
  func.func @transform_8(%arg0: i32) -> (i32, i32) {
    %c0_i32 = arith.constant 0 : i32
    %c0_i32_0 = arith.constant 0 : i32
    %c0_i32_1 = arith.constant 0 : i32
    return %c0_i32, %c0_i32_0 : i32, i32
  }
  func.func @transform_9(%arg0: i32) -> (i32, i32) {
    %c0_i32 = arith.constant 0 : i32
    %c0_i32_0 = arith.constant 0 : i32
    %c0_i32_1 = arith.constant 0 : i32
    return %c0_i32, %c0_i32_0 : i32, i32
  }
  func.func @transform_10(%arg0: i32) -> (i32, i32, i32) {
    %c0_i32 = arith.constant 0 : i32
    %c0_i32_0 = arith.constant 0 : i32
    %c0_i32_1 = arith.constant 0 : i32
    return %arg0, %c0_i32, %c0_i32_0 : i32, i32, i32
  }
}

</mosaic_0001>

<bundles_post_ra>
// kernel: learnable_adj_hetero_conv_forward.1
= control target key start
LH: loop header
LB: loop body
LE: loop exit
PB: predicated region body
PF: predicated region fallthrough
CT: control target
= control target key end

     0   :  { %vm1787_vm0 = vcmask 261120   ;;  %v1394_v2 = vmov 0   ;;  %v1395_v9 = vmov 0.0   ;;  %vm1396_vm1 = vmmov 0   ;;  %s1398_s28 = smov 32   ;;  %s1775_s0 = inlined_call_operand.vmem [shape: f32[1,32,64], index: 0, kind: input, shape index: {}]   ;;  %s1776_s1 = inlined_call_operand.vmem [shape: f32[10,32], index: 1, kind: input, shape index: {}]   ;;  %s1777_s2 = inlined_call_operand.vmem [shape: f32[10,1], index: 2, kind: input, shape index: {}]   ;;  %s1778_s3 = inlined_call_operand.vmem [shape: f32[3,32,48], index: 3, kind: input, shape index: {}]   ;;  %s1779_s5 = inlined_call_operand.vmem [shape: f32[32,48], index: 5, kind: input, shape index: {}]   ;;  %s1780_s6 = inlined_call_operand.vmem [shape: f32[48,32], index: 6, kind: input, shape index: {}]   ;;  %s1781_s4 = inlined_call_operand.vmem [shape: f32[1,48], index: 4, kind: input, shape index: {}]   ;;  %s1782_s7 = inlined_call_operand.vmem [shape: f32[1,32], index: 7, kind: input, shape index: {}]   ;;  %s1783_s9 = inlined_call_operand.vmem [shape: f32[8,1], index: 9, kind: input, shape index: {}]   ;;  %s1784_s8 = inlined_call_operand.vmem [shape: f32[8,10], index: 8, kind: input, shape index: {}]   ;;  %s1785_s10 = inlined_call_operand.vmem [shape: f32[1,8,64], index: 10, kind: output, shape index: {}]  }
   0x1   :  { %v38_v0 = vld [vmem:[%s1775_s0 + $0x18] sm:$0xff]  ;;  %v37_v1 = vld [vmem:[%s1775_s0 + $0x10] sm:$0xff]  ;;  %1393 = vset.pattern.permute.xlu0 %v1394_v2  ;;  %v39_v3 = vld [vmem:[%s1776_s1] sm:$0xff]  ;;  %1272 = vmatprep.subr.mxu1 %v1395_v9  ;;  %vm1786_vm2 = vcmask 1041408   ;;  %v147_v20 = vlaneseq  ;;  %vm166_vm7 = vcmask 1043456   ;;  %vm162_vm12 = vcmask 162816  }
   0x2   :  { %1261 = vmatprep.subr.mxu0 %v38_v0  ;;  %v36_v4 = vld [vmem:[%s1775_s0 + $0x8] sm:$0xff]  ;;  %1269 = vmatprep.mubr.msk.f32.mxu0 %vm1787_vm0, %v39_v3  ;;  %v41_v5 = vld [vmem:[%s1777_s2] sm:$0xff]  ;;  %v1181_v19 = vld [vmem:[%s1778_s3 + $0x38] sm:$0xff] }
   0x3   :  { %1262 = vmatpush3.msra.mxu0 %v38_v0  ;;  %45 = vperm.xlu0 %1393, %v41_v5   ;;  %v35_v6 = vld [vmem:[%s1775_s0] sm:$0xff]  ;;  %v42_v7 = vld [vmem:[%s1777_s2 + $0x8] sm:$0x3]  ;;  %s1397_s0 = smov 96   ;;  %v1494_v21 = vshrl.u32 %v147_v20, 7  ;;  %v1497_v23 = vand.u32 127, %v147_v20 }
   0x4   :  { %1263 = vmatprep.subr.mxu0 %v37_v1  ;;  %v40_v8 = vld [vmem:[%s1776_s1 + $0x8] sm:$0x3]  ;;  %1278 = vmatprep.mubr.msk.f32.mxu1 %vm1396_vm1, %v1395_v9  ;;  %v242_v32 = vld [vmem:[%s1778_s3 + $0x18] sm:$0xff]  ;;  %v241_v33 = vld [vmem:[%s1778_s3 + $0x10] sm:$0xff] }
   0x5   :  { %1264 = vmatpush3.msra.mxu0 %v37_v1  ;;  %v151_v22 = vmul.u32 10, %v1494_v21  ;;  %v240_v34 = vld [vmem:[%s1778_s3 + $0x8] sm:$0xff]  ;;  %v239_v35 = vld [vmem:[%s1778_s3] sm:$0xff]  ;;  %v1180_v36 = vld [vmem:[%s1778_s3 + $0x30] sm:$0xff]  ;;  %v631_v59 = vmul.u32 10, %v1497_v23  ;;  %v1643_v61 = vadd.s32 8, %v1494_v21 }
   0x6   :  { %1265 = vmatprep.subr.mxu0 %v36_v4  ;;  %v1179_v37 = vld [vmem:[%s1778_s3 + $0x28] sm:$0xff]  ;;  %v1178_v38 = vld [vmem:[%s1778_s3 + $0x20] sm:$0xff]  ;;  %v1189_v44 = vld [vmem:[%s1778_s3 + $0x58] sm:$0xff]  ;;  %v1648_v62 = vadd.s32 16, %v1494_v21 }
   0x7   :  { %1266 = vmatpush3.msra.mxu0 %v36_v4  ;;  %50 = vperm.xlu0 %1393, %v42_v7   ;;  %v153_v24 = vadd.s32 10, %v151_v22  ;;  %v1500_v25 = vsub.s32 %v1497_v23, %v151_v22  ;;  %vm152_vm3 = vcmp.ge.s32.totalorder %v1497_v23, %v151_v22  ;;  %v1188_v45 = vld [vmem:[%s1778_s3 + $0x50] sm:$0xff]  ;;  %v1187_v46 = vld [vmem:[%s1778_s3 + $0x48] sm:$0xff]  ;;  %v1186_v47 = vld [vmem:[%s1778_s3 + $0x40] sm:$0xff]  ;;  %v635_v60 = vadd.s32 10, %v631_v59 }
   0x8   :  { %1267 = vmatprep.subr.mxu0 %v35_v6  ;;  %v741_v53 = vld [vmem:[%s1779_s5 + $0x18] sm:$0xff]  ;;  %v740_v55 = vld [vmem:[%s1779_s5 + $0x10] sm:$0xff]  ;;  %v739_v57 = vld [vmem:[%s1779_s5 + $0x8] sm:$0xff] }
   0x9   :  { %1268 = vmatpush3.msra.mxu0 %v35_v6  ;;  %vm154_vm4 = vcmp.lt.s32.totalorder %v1497_v23, %v153_v24  ;;  %vm157_vm6 = vcmp.ge.s32.totalorder %v1500_v25, 0  ;;  %vm159_vm9 = vcmp.lt.s32.totalorder %v1500_v25, 3  ;;  %vm243_vm11 = vcmp.ge.s32.totalorder %v1500_v25, 3  ;;  %v738_v58 = vld [vmem:[%s1779_s5] sm:$0xff]  ;;  %v970_v3 = vld [vmem:[%s1780_s6 + $0x28] sm:$0xff] }
   0xa   :  { %1270 = vmatmul.mubr.msk.f32.vlgmr.msra.gmra.mxu0 %vm1787_vm0, %v40_v8  ;;  %1290 = vmatprep.subr.mxu0 %v1395_v9  ;;  %vm1504_vm5 = vmand %vm152_vm3, %vm154_vm4  ;;  %vm245_vm14 = vcmp.lt.s32.totalorder %v1500_v25, 7  ;;  %vm472_vm3 = vcmp.ge.s32.totalorder %v1500_v25, 7 }
   0xb   :  { %1298 = vmatprep.mubr.msk.f32.mxu0 %vm1396_vm1, %v1395_v9  ;;  %1291 = vmatpush3.msra.mxu0 %v1181_v19  ;;  %vm158_vm8 = vmand %vm1504_vm5, %vm157_vm6  ;;  %vm474_vm6 = vcmp.lt.s32.totalorder %v1500_v25, 10  ;;  %v1198_v25 = vld [vmem:[%s1781_s4] ss:$0 sm:$0xff] }
   0xc   :  { %1292 = vmatprep.subr.mxu0 %v1395_v9  ;;  %vm160_vm10 = vmand %vm158_vm8, %vm159_vm9 }
   0xd   :  { %v161_v30 = vsel %vm160_vm10, 1.0, %v1395_v9  ;;  %vm244_vm13 = vmand %vm1504_vm5, %vm243_vm11  ;;  %1293 = vmatpush3.msra.mxu0 %v1180_v36  ;;  %vm633_vm10 = vcmp.ge.s32.totalorder %v1643_v61, %v631_v59  ;;  %vm637_vm11 = vcmp.lt.s32.totalorder %v1643_v61, %v635_v60 }
   0xe   :  { %vm246_vm15 = vmand %vm244_vm13, %vm245_vm14  ;;  %1294 = vmatprep.subr.mxu0 %v1395_v9  ;;  %vm634_vm14 = vcmp.ge.s32.totalorder %v1648_v62, %v631_v59 }
   0xf   :  { %v247_v31 = vsel %vm246_vm15, 1.0, %v1395_v9  ;;  %1295 = vmatpush3.msra.mxu0 %v1179_v37  ;;  %vm473_vm4 = vmand %vm1504_vm5, %vm472_vm3  ;;  %vm632_vm5 = vcmp.ge.s32.totalorder %v1494_v21, %v631_v59  ;;  %vm638_vm15 = vcmp.lt.s32.totalorder %v1648_v62, %v635_v60 }
  0x10   :  { %1296 = vmatprep.subr.mxu0 %v1395_v9  ;;  %vm475_vm8 = vmand %vm473_vm4, %vm474_vm6  ;;  %vm877_vm4 = vcmp.ge.s32.totalorder %v1494_v21, 3  ;;  %vm880_vm6 = vcmp.lt.s32.totalorder %v1494_v21, 7 }
  0x11   :  { %1297 = vmatpush3.msra.mxu0 %v1178_v38  ;;  %v476_v43 = vsel %vm475_vm8, 1.0, %v1395_v9  ;;  %vm640_vm13 = vmand %vm633_vm10, %vm637_vm11  ;;  %vm898_vm8 = vcmp.ge.s32.totalorder %v1497_v23, 16 }
  0x12   :  { %1312 = vmatprep.subr.mxu0 %v1395_v9  ;;  %v643_v4 = vsel %vm640_vm13, 1.0, %v1395_v9  ;;  %vm641_vm3 = vmand %vm634_vm14, %vm638_vm15  ;;  %vm940_vm13 = vcmp.lt.s32.totalorder %v1497_v23, 48  ;;  %vm849_vm15 = vcmp.ge.s32.totalorder %v1643_v61, 10 }
  0x13   :  { %v644_v6 = vsel %vm641_vm3, 1.0, %v1395_v9  ;;  %vm883_vm10 = vmand %vm877_vm4, %vm880_vm6  ;;  %vm852_vm3 = vcmp.lt.s32.totalorder %v1643_v61, 13  ;;  %vm918_vm4 = vcmp.ge.s32.totalorder %v1494_v21, 7 }
  0x7e   :  { %v46_v10 = vpop.permute.xlu0 %45 }
  0x82   :  { %v51_v11 = vpop.permute.xlu0 %50 }
  0xca   :  { %v1271_v12 = vpop.f32.mrf.mxu0 }
  0xcb   :  { %v132_v13 = vadd.f32 %v1271_v12, %v51_v11 }
  0xcc   :  { %v126_v14 = vpop.f32.mrf.mxu0 }
  0xcd   :  { %v1486_v15 = vadd.f32 %v126_v14, %v46_v10  ;;  %v139_v16 = vrot.slane %v132_v13, 6  ;;  %v968_v14 = vld [vmem:[%s1780_s6 + $0x18] sm:$0xff] }
  0xcf   :  { %v138_v17 = vrot.slane %v1486_v15, 6 }
  0xd1   :  { %v140_v18 = vsel %vm1786_vm2, %v138_v17, %v139_v16  ;;  %v966_v16 = vld [vmem:[%s1780_s6 + $0x8] sm:$0xff] }
  0xd2   :  { %143 = vrot.lane.b32.xlu1 %v140_v18, %s1397_s0 }
  0xd6   :  { %141 = vrot.lane.b32.xlu1 %v138_v17, %s1397_s0  ;;  %v965_v17 = vld [vmem:[%s1780_s6] sm:$0xff] }
 0x144   :  { %v1509_v27 = vpop.permute.xlu1 %143 }
 0x145   :  { %1273 = vmatpush3.msk.msra.mxu1 %vm166_vm7, %v1509_v27 }
 0x146   :  { %1274 = vmatprep.subr.mxu1 %v1395_v9 }
 0x148   :  { %v142_v28 = vpop.permute.xlu1 %141 }
 0x149   :  { %v1519_v29 = vsel %vm1786_vm2, %v132_v13, %v142_v28  ;;  %v969_v13 = vld [vmem:[%s1780_s6 + $0x20] sm:$0xff] }
 0x14a   :  { %1275 = vmatpush3.msra.mxu1 %v1519_v29 }
 0x14b   :  { %1276 = vmatprep.subr.mxu1 %v1395_v9 }
 0x14c   :  { %1277 = vmatpush3.msra.mxu1 %v1486_v15 }
 0x14d   :  { %1279 = vmatmul.mubr.msk.f32.vlgmr.msra.gmra.mxu1 %vm162_vm12, %v161_v30  ;;  %1281 = vmatprep.subr.mxu1 %v1395_v9 }
 0x14e   :  { %1282 = vmatpush3.msk.msra.mxu1 %vm166_vm7, %v1509_v27  ;;  %1287 = vmatprep.mubr.msk.f32.mxu1 %vm1396_vm1, %v1395_v9 }
 0x14f   :  { %1283 = vmatprep.subr.mxu1 %v1395_v9 }
 0x150   :  { %1284 = vmatpush3.msra.mxu1 %v1519_v29 }
 0x151   :  { %1285 = vmatprep.subr.mxu1 %v1395_v9 }
 0x152   :  { %1286 = vmatpush3.msra.mxu1 %v1486_v15 }
 0x153   :  { %1288 = vmatmul.mubr.msk.f32.vlgmr.msra.gmra.mxu1 %vm162_vm12, %v247_v31  ;;  %1301 = vmatprep.subr.mxu1 %v1395_v9 }
 0x154   :  { %1302 = vmatpush3.msra.mxu1 %v242_v32  ;;  %1309 = vmatprep.mubr.msk.f32.mxu1 %vm1396_vm1, %v1395_v9 }
 0x155   :  { %1303 = vmatprep.subr.mxu1 %v1395_v9 }
 0x156   :  { %1304 = vmatpush3.msra.mxu1 %v241_v33 }
 0x157   :  { %1305 = vmatprep.subr.mxu1 %v1395_v9 }
 0x158   :  { %1306 = vmatpush3.msra.mxu1 %v240_v34 }
 0x159   :  { %1307 = vmatprep.subr.mxu1 %v1395_v9 }
 0x15a   :  { %1308 = vmatpush3.msra.mxu1 %v239_v35 }
 0x15b   :  { %1321 = vmatprep.subr.mxu1 %v1395_v9 }
 0x20d   :  { %v235_v39 = vpop.f32.mrf.mxu1 }
 0x20e   :  { %1310 = vmatmul.mubr.msk.f32.vlgmr.msra.gmra.mxu1 %vm1787_vm0, %v235_v39 }
 0x20f   :  { %v1280_v40 = vpop.f32.mrf.mxu1  ;;  %1329 = vmatprep.mubr.msk.f32.mxu1 %vm1396_vm1, %v1395_v9  ;;  %1322 = vmatpush3.msra.mxu1 %v1189_v44 }
 0x210   :  { %1323 = vmatprep.subr.mxu1 %v1395_v9 }
 0x211   :  { %1324 = vmatpush3.msra.mxu1 %v1188_v45 }
 0x212   :  { %1325 = vmatprep.subr.mxu1 %v1395_v9 }
 0x213   :  { %v317_v41 = vpop.f32.mrf.mxu1  ;;  %1326 = vmatpush3.msra.mxu1 %v1187_v46 }
 0x214   :  { %1299 = vmatmul.mubr.msk.f32.vlgmr.msra.gmra.mxu0 %vm1787_vm0, %v317_v41  ;;  %1327 = vmatprep.subr.mxu1 %v1395_v9 }
 0x215   :  { %1313 = vmatpush3.msk.msra.mxu0 %vm166_vm7, %v1509_v27  ;;  %v1289_v42 = vpop.f32.mrf.mxu1  ;;  %1318 = vmatprep.mubr.msk.f32.mxu0 %vm1396_vm1, %v1395_v9  ;;  %vm636_vm7 = vcmp.lt.s32.totalorder %v1494_v21, %v635_v60 }
 0x216   :  { %1314 = vmatprep.subr.mxu0 %v1395_v9  ;;  %1328 = vmatpush3.msra.mxu1 %v1186_v47  ;;  %vm639_vm9 = vmand %vm632_vm5, %vm636_vm7  ;;  %vm899_vm5 = vcmp.lt.s32.totalorder %v1497_v23, 32  ;;  %vm842_vm7 = vcmp.lt.s32.totalorder %v1494_v21, 3 }
 0x217   :  { %1315 = vmatpush3.msra.mxu0 %v1519_v29  ;;  %1343 = vmatprep.subr.mxu1 %v1395_v9  ;;  %v642_v1 = vsel %vm639_vm9, 1.0, %v1395_v9  ;;  %vm861_vm9 = vcmp.lt.s32.totalorder %v1497_v23, 16  ;;  %vm1699_vm11 = vmand %vm898_vm8, %vm899_vm5  ;;  %vm887_vm5 = vcmp.ge.s32.totalorder %v1643_v61, 13 }
 0x218   :  { %1316 = vmatprep.subr.mxu0 %v1395_v9  ;;  %vm871_vm14 = vmand %vm842_vm7, %vm861_vm9 }
 0x219   :  { %1317 = vmatpush3.msra.mxu0 %v1486_v15  ;;  %vm855_vm8 = vmand %vm849_vm15, %vm852_vm3  ;;  %v874_v20 = vsel %vm871_vm14, 1.0, %v1395_v9  ;;  %vm932_vm15 = vcmp.lt.s32.totalorder %v1648_v62, 20 }
 0x21a   :  { %1319 = vmatmul.mubr.msk.f32.vlgmr.msra.gmra.mxu0 %vm162_vm12, %v476_v43  ;;  %1332 = vmatprep.subr.mxu0 %v1395_v9  ;;  %vm645_vm12 = vcmask 15360   ;;  %vm872_vm7 = vmand %vm855_vm8, %vm861_vm9  ;;  %vm891_vm9 = vcmp.lt.s32.totalorder %v1648_v62, 17  ;;  %vm1798_vm8 = vcmask 1041408  }
 0x21b   :  { %1334 = vmatprep.mubr.msk.f32.mxu0 %vm1396_vm1, %v1395_v9 }
 0x2ce   :  { %v468_v48 = vpop.f32.mrf.mxu1 }
 0x2d0   :  { %v1311_v49 = vpop.f32.mrf.mxu1 }
 0x2d4   :  { %v395_v50 = vpop.f32.mrf.mxu0 }
 0x2d5   :  { %v469_v51 = vadd.f32 %v468_v48, %v395_v50 }
 0x2d6   :  { %v1300_v52 = vpop.f32.mrf.mxu0 }
 0x2da   :  { %v546_v54 = vpop.f32.mrf.mxu0 }
 0x2db   :  { %1330 = vmatmul.mubr.msk.f32.vlgmr.msra.gmra.mxu1 %vm1787_vm0, %v546_v54 }
 0x2dc   :  { %1344 = vmatpush3.msra.mxu1 %v741_v53  ;;  %v1320_v56 = vpop.f32.mrf.mxu0  ;;  %1351 = vmatprep.mubr.msk.f32.mxu1 %vm1396_vm1, %v1395_v9  ;;  %v1199_v53 = vld [vmem:[%s1782_s7] ss:$0 sm:$0xff] }
 0x2dd   :  { %1345 = vmatprep.subr.mxu1 %v1395_v9 }
 0x2de   :  { %1346 = vmatpush3.msra.mxu1 %v740_v55 }
 0x2df   :  { %1347 = vmatprep.subr.mxu1 %v1395_v9 }
 0x2e0   :  { %1348 = vmatpush3.msra.mxu1 %v739_v57 }
 0x2e1   :  { %1349 = vmatprep.subr.mxu1 %v1395_v9 }
 0x2e2   :  { %1350 = vmatpush3.msra.mxu1 %v738_v58 }
 0x2e3   :  { %1352 = vmatmul.mubr.msk.f32.vlgmr.msra.gmra.mxu1 %vm1787_vm0, %v1486_v15  ;;  %1381 = vmatprep.subr.mxu1 %v1395_v9  ;;  %v967_v15 = vld [vmem:[%s1780_s6 + $0x10] sm:$0xff] }
 0x2e4   :  { %1354 = vmatprep.mubr.msk.f32.mxu1 %vm1396_vm1, %v1395_v9 }
 0x2e7   :  { %1355 = vmatmul.mubr.msk.f32.gmra.mxu1 %vm1787_vm0, %v1519_v29 }
 0x2e8   :  { %1357 = vmatprep.mubr.msk.f32.mxu1 %vm1396_vm1, %v1395_v9 }
 0x2eb   :  { %1358 = vmatmul.mubr.msk.f32.gmra.mxu1 %vm1787_vm0, %v1509_v27 }
 0x2ec   :  { %1385 = vmatprep.mubr.msk.f32.mxu1 %vm1396_vm1, %v1395_v9 }
 0x39b   :  { %v624_v63 = vpop.f32.mrf.mxu1 }
 0x39c   :  { %v628_v0 = vadd.f32 %v624_v63, %v469_v51 }
 0x39d   :  { %v1331_v2 = vpop.f32.mrf.mxu1 }
 0x39e   :  { %1333 = vmatpush3.msk.msra.mxu0 %vm1786_vm2, %v628_v0  ;;  %vm909_vm2 = vmand %vm883_vm10, %vm1699_vm11  ;;  %v1083_v2 = vld [vmem:[%s1783_s9] sm:$0xff] }
 0x39f   :  { %1335 = vmatmul.mubr.msk.f32.vlgmr.msra.gmra.mxu0 %vm645_vm12, %v642_v1  ;;  %1360 = vmatprep.subr.mxu0 %v1395_v9  ;;  %v912_v22 = vsel %vm909_vm2, 1.0, %v1395_v9  ;;  %vm910_vm10 = vmand %vm887_vm5, %vm1699_vm11  ;;  %vm1089_vm5 = vcmask 80896  }
 0x3a0   :  { %1337 = vmatprep.mubr.msk.f32.mxu0 %vm1396_vm1, %v1395_v9  ;;  %1361 = vmatpush3.msra.mxu0 %v970_v3  ;;  %v915_v21 = vadd.f32 %v912_v22, %v874_v20  ;;  %v913_v27 = vsel %vm910_vm10, 1.0, %v1395_v9 }
 0x3a1   :  { %1362 = vmatprep.subr.mxu0 %v1395_v9 }
 0x3a2   :  { %1363 = vmatpush3.msra.mxu0 %v969_v13 }
 0x3a3   :  { %v815_v5 = vpop.f32.mrf.mxu1  ;;  %1338 = vmatmul.mubr.msk.f32.gmra.mxu0 %vm645_vm12, %v643_v4  ;;  %1364 = vmatprep.subr.mxu0 %v1395_v9 }
 0x3a4   :  { %1340 = vmatprep.mubr.msk.f32.mxu0 %vm1396_vm1, %v1395_v9  ;;  %1365 = vmatpush3.msra.mxu0 %v968_v14 }
 0x3a5   :  { %v1353_v7 = vpop.f32.mrf.mxu1  ;;  %1366 = vmatprep.subr.mxu0 %v1395_v9 }
 0x3a6   :  { %1367 = vmatpush3.msra.mxu0 %v967_v15  ;;  %v1082_v7 = vld [vmem:[%s1784_s8] sm:$0xff] }
 0x3a7   :  { %v1667_v8 = vpop.f32.mrf.mxu1  ;;  %1341 = vmatmul.mubr.msk.f32.gmra.mxu0 %vm645_vm12, %v644_v6  ;;  %1368 = vmatprep.subr.mxu0 %v1395_v9  ;;  %vm939_vm12 = vcmp.ge.s32.totalorder %v1497_v23, 32  ;;  %v875_v23 = vsel %vm872_vm7, 1.0, %v1395_v9  ;;  %vm1166_vm7 = vcmask 523264  }
 0x3a8   :  { %1372 = vmatprep.mubr.msk.f32.mxu0 %vm1396_vm1, %v1395_v9  ;;  %1369 = vmatpush3.msra.mxu0 %v966_v16  ;;  %vm1712_vm6 = vmand %vm939_vm12, %vm940_vm13  ;;  %vm922_vm12 = vcmp.lt.s32.totalorder %v1643_v61, 10  ;;  %vm929_vm13 = vcmp.ge.s32.totalorder %v1648_v62, 17  ;;  %v916_v33 = vadd.f32 %v913_v27, %v875_v23 }
 0x3a9   :  { %v1356_v10 = vpop.f32.mrf.mxu1  ;;  %1370 = vmatprep.subr.mxu0 %v1395_v9  ;;  %vm950_vm0 = vmand %vm918_vm4, %vm1712_vm6  ;;  %vm978_vm4 = vcmask 392192  }
 0x3aa   :  { %1371 = vmatpush3.msra.mxu0 %v965_v17  ;;  %v953_v26 = vsel %vm950_vm0, 1.0, %v1395_v9  ;;  %vm951_vm2 = vmand %vm922_vm12, %vm1712_vm6 }
 0x3ab   :  { %v1672_v11 = vpop.f32.mrf.mxu1  ;;  %vm1737_vm14 = vmand %vm929_vm13, %vm932_vm15  ;;  %v956_v32 = vadd.f32 %v953_v26, %v915_v21  ;;  %v954_v35 = vsel %vm951_vm2, 1.0, %v1395_v9 }
 0x3ac   :  { %vm911_vm0 = vmand %vm891_vm9, %vm1699_vm11  ;;  %v957_v41 = vadd.f32 %v954_v35, %v916_v33  ;;  %vm1070_vm11 = vcmask 1045504  }
 0x3ad   :  { %v1359_v12 = vpop.f32.mrf.mxu1  ;;  %vm952_vm3 = vmand %vm1737_vm14, %vm1712_vm6  ;;  %v914_v43 = vsel %vm911_vm0, 1.0, %v1395_v9 }
 0x3ae   :  { %v955_v44 = vsel %vm952_vm3, 1.0, %v1395_v9 }
 0x3af   :  { %v958_v50 = vadd.f32 %v955_v44, %v914_v43 }
 0x45f   :  { %v724_v24 = vpop.f32.mrf.mxu0 }
 0x460   :  { %v816_v28 = vadd.f32 %v815_v5, %v724_v24 }
 0x461   :  { %v1336_v29 = vpop.f32.mrf.mxu0 }
 0x462   :  { %v836_v31 = vadd.f32 %v1198_v25, %v816_v28 }
 0x463   :  { %v729_v34 = vpop.f32.mrf.mxu0 }
 0x464   :  { %v959_v36 = vmax.f32 %v836_v31, 0.0  ;;  %v821_v37 = vadd.f32 %v1667_v8, %v729_v34 }
 0x465   :  { %v1339_v38 = vpop.f32.mrf.mxu0 }
 0x466   :  { %v962_v39 = vmul.f32 %v959_v36, %v956_v32  ;;  %v837_v40 = vadd.f32 %v1198_v25, %v821_v37 }
 0x467   :  { %v734_v42 = vpop.f32.mrf.mxu0 }
 0x468   :  { %v960_v45 = vmax.f32 %v837_v40, 0.0  ;;  %v826_v46 = vadd.f32 %v1672_v11, %v734_v42  ;;  %1373 = vmatmul.mubr.msk.f32.vlgmr.msra.gmra.mxu0 %vm978_vm4, %v962_v39 }
 0x469   :  { %v1342_v47 = vpop.f32.mrf.mxu0  ;;  %1375 = vmatprep.mubr.msk.f32.mxu0 %vm1396_vm1, %v1395_v9 }
 0x46a   :  { %v963_v48 = vmul.f32 %v960_v45, %v957_v41  ;;  %v838_v49 = vadd.f32 %v1198_v25, %v826_v46 }
 0x46c   :  { %v961_v51 = vmax.f32 %v838_v49, 0.0  ;;  %1376 = vmatmul.mubr.msk.f32.gmra.mxu0 %vm978_vm4, %v963_v48 }
 0x46d   :  { %1378 = vmatprep.mubr.msk.f32.mxu0 %vm1396_vm1, %v1395_v9  ;;  %vm1796_vm1 = vcmask 261120  }
 0x46e   :  { %v964_v52 = vmul.f32 %v961_v51, %v958_v50  ;;  %vm1797_vm6 = vmmov %vm1796_vm1 }
 0x470   :  { %1379 = vmatmul.mubr.msk.f32.gmra.mxu0 %vm978_vm4, %v964_v52 }
 0x528   :  { %v1054_v54 = vpop.f32.mrf.mxu0 }
 0x529   :  { %v1055_v55 = vadd.f32 %v1199_v53, %v1054_v54 }
 0x52a   :  { %v1374_v56 = vpop.f32.mrf.mxu0 }
 0x52c   :  { %v1059_v57 = vpop.f32.mrf.mxu0 }
 0x52d   :  { %v1060_v59 = vadd.f32 %v1199_v53, %v1059_v57 }
 0x52e   :  { %v1377_v58 = vpop.f32.mrf.mxu0 }
 0x52f   :  { %v1071_v63 = vrot.slane %v1060_v59, 2 }
 0x530   :  { %v1064_v60 = vpop.f32.mrf.mxu0 }
 0x531   :  { %v1065_v61 = vadd.f32 %v1199_v53, %v1064_v60 }
 0x532   :  { %v1380_v62 = vpop.f32.mrf.mxu0 }
 0x533   :  { %v1072_v0 = vrot.slane %v1065_v61, 2 }
 0x535   :  { %1076 = vrot.lane.b32.xlu0 %v1072_v0, %s1398_s28  ;;  %v1073_v1 = vsel %vm1070_vm11, %v1071_v63, %v1072_v0 }
 0x536   :  { %1074 = vrot.lane.b32.xlu1 %v1073_v1, %s1398_s28 }
 0x539   :  { %1086 = vperm.xlu0 %1393, %v1083_v2  }
 0x5a7   :  { %v1077_v3 = vpop.permute.xlu0 %1076 }
 0x5a8   :  { %v1081_v4 = vsel %vm1796_vm1, %v1060_v59, %v1077_v3  ;;  %v1075_v5 = vpop.permute.xlu1 %1074 }
 0x5a9   :  { %v1080_v6 = vsel %vm1797_vm6, %v1055_v55, %v1075_v5  ;;  %1382 = vmatpush3.msk.msra.mxu1 %vm1798_vm8, %v1081_v4 }
 0x5aa   :  { %1383 = vmatprep.subr.mxu1 %v1395_v9 }
 0x5ab   :  { %1384 = vmatpush3.msra.mxu1 %v1080_v6 }
 0x5ac   :  { %1386 = vmatmul.mubr.msk.f32.vlgmr.msra.gmra.mxu1 %vm1089_vm5, %v1082_v7 }
 0x5b4   :  { %v1087_v8 = vpop.permute.xlu0 %1086 }
 0x66c   :  { %v1162_v10 = vpop.f32.mrf.mxu1 }
 0x66d   :  { %v1163_v11 = vadd.f32 %v1162_v10, %v1087_v8 }
 0x66e   :  { %v1387_v12 = vpop.f32.mrf.mxu1 }
 0x66f   :  { %1167 = vst.msk [vmem:[%s1785_s10] sm:$0xff] %vm1166_vm7, %v1163_v11 }

</bundles_post_ra>
